<compile_context>
chip_gen: v5e
topology: v5e:2x2
jax: 0.10.0
libtpu: 0.0.40
codegen_flags: <defaults>
</compile_context>

<pallas_src>
import jax
import jax.numpy as jnp
from jax import lax
from jax.experimental import pallas as pl
from jax.experimental.pallas import tpu as pltpu

_LANES = 128
_MAX_SUB_TILE = 512                       # sublane-tiles per grid step (512*128 lanes)
_VMEM_BYTES_PER_BUFFER = 4 * 1024 * 1024  # per in/out buffer; x4 for double-buffered in+out


# ----------------------------------------------------------------------------
# Sorting-network generation (comparator lists, applied sequentially).
# ----------------------------------------------------------------------------
def _oddeven_merge(lo, hi, r, pairs):
    step = r * 2
    if step < hi - lo:
        _oddeven_merge(lo, hi, step, pairs)
        _oddeven_merge(lo + r, hi, step, pairs)
        pairs.extend((i, i + r) for i in range(lo + r, hi - r, step))
    else:
        pairs.append((lo, lo + r))


def _oddeven_mergesort(lo, hi, pairs):
    if hi - lo >= 1:
        mid = lo + (hi - lo) // 2
        _oddeven_mergesort(lo, mid, pairs)
        _oddeven_mergesort(mid + 1, hi, pairs)
        _oddeven_merge(lo, hi, 1, pairs)


def _sorting_network(n: int):
    """Comparators (a, b), a < b; applying (min->a, max->b) in order sorts."""
    if n <= 1:
        return []
    if n & (n - 1) == 0:
        # Power of two: Batcher odd-even mergesort, O(n log^2 n) comparators.
        pairs = []
        _oddeven_mergesort(0, n - 1, pairs)
        return pairs
    # General n: odd-even transposition network, O(n^2) comparators.
    return [(i, i + 1) for phase in range(n) for i in range(phase % 2, n - 1, 2)]


# ----------------------------------------------------------------------------
# Pallas kernel
# ----------------------------------------------------------------------------
def _make_group_sort_kernel(n: int, sub_tile: int, chunk: int):
    """Kernel over a (n, sub_tile, 128) block: sort ascending along axis 0."""
    pairs = _sorting_network(n)
    num_full = sub_tile // chunk
    tail = sub_tile - num_full * chunk

    def sort_window(x_ref, o_ref, start, size):
        # Each row is a whole (size, 128) vreg-aligned slab -> full-vreg VPU
        # min/max, no sublane shuffles.
        rows = [x_ref[i, pl.ds(start, size), :] for i in range(n)]
        for a, b in pairs:
            lo = jnp.minimum(rows[a], rows[b])
            hi = jnp.maximum(rows[a], rows[b])
            rows[a], rows[b] = lo, hi
        for i in range(n):
            o_ref[i, pl.ds(start, size), :] = rows[i]

    def kernel(x_ref, o_ref):
        # Walk the (large) block in small sublane chunks so the live working
        # set (n rows x chunk/8 vregs each) fits the 64-entry vreg file.
        if num_full > 0:
            def body(c, carry):
                start = pl.multiple_of(c * chunk, 8)
                sort_window(x_ref, o_ref, start, chunk)
                return carry
            lax.fori_loop(0, num_full, body, 0, unroll=(num_full <= 8))
        if tail > 0:
            sort_window(x_ref, o_ref, num_full * chunk, tail)

    return kernel


def _sort_slab(slab: jax.Array, n: int) -> jax.Array:
    """Sort a (n, M) slab ascending along axis 0 with the Pallas kernel."""
    _, m = slab.shape
    dtype = slab.dtype
    if m == 0:
        return slab

    # Lane-align M.  The pad/slice round-trip (an extra HBM copy each way) only
    # happens when M is not already a multiple of 128.
    n_sub = pl.cdiv(m, _LANES)
    m_pad = n_sub * _LANES
    padded = m_pad != m
    if padded:
        slab = jnp.pad(slab, ((0, 0), (0, m_pad - m)))

    # Free reshape: group member i becomes a dense (n_sub, 128) slab in HBM.
    slab3 = slab.reshape(n, n_sub, _LANES)

    itemsize = jnp.dtype(dtype).itemsize
    # Sublane chunk per inner-loop step: keep ~<=16 vregs of rows live.
    chunk = max(8, min(32, ((128 // max(n, 1)) // 8) * 8))
    # Widest block that keeps one in/out buffer under the VMEM budget
    # (2 in + 2 out double buffers; sized with v7x's 64 MiB VMEM in mind).
    granule = max(chunk, 32 // itemsize)
    cap = _VMEM_BYTES_PER_BUFFER // (n * _LANES * itemsize)
    cap = max(granule, (cap // granule) * granule)
    sub_tile = min(_MAX_SUB_TILE, cap)
    if n_sub <= sub_tile:
        sub_tile = n_sub  # single block; block dim == full array dim is legal
    grid = (pl.cdiv(n_sub, sub_tile),)

    kernel = _make_group_sort_kernel(n, sub_tile, chunk)
    out3 = pl.pallas_call(
        kernel,
        out_shape=jax.ShapeDtypeStruct((n, n_sub, _LANES), dtype),
        grid_spec=pltpu.PrefetchScalarGridSpec(
            num_scalar_prefetch=0,
            grid=grid,
            in_specs=[pl.BlockSpec((n, sub_tile, _LANES), lambda j: (0, j, 0))],
            out_specs=pl.BlockSpec((n, sub_tile, _LANES), lambda j: (0, j, 0)),
        ),
        compiler_params=pltpu.CompilerParams(
            dimension_semantics=("parallel",)),
    )(slab3)

    out = out3.reshape(n, m_pad)
    if padded:
        out = out[:, :m]
    return out


# ----------------------------------------------------------------------------
# Module-level glue (mirrors monotone/group.py)
# ----------------------------------------------------------------------------
def get_sorting_shape(x: jax.Array, n_per_group: int, axis: int = -1) -> list:
    shape = list(x.shape)
    num_features = shape[axis]
    if num_features % n_per_group:
        raise ValueError(
            f"number of features({num_features}) needs to be a multiple of "
            f"n_per_group({n_per_group})")
    shape[axis] = -1
    if axis == -1:
        shape.append(n_per_group)
    else:
        shape.insert(axis + 1, n_per_group)
    return shape


def group_sort(x: jax.Array, n_per_group: int, axis: int = -1) -> jax.Array:
    if x.shape[0] == 0:
        return x
    if x.size == 0 or n_per_group == 1:
        return x

    # Correctness fix: normalize negative axes so axis=-2 etc. sort the
    # inserted group dimension rather than the trailing feature dimension.
    axis = axis % x.ndim

    size = get_sorting_shape(x, n_per_group, axis)
    grouped = x.reshape(size)          # (..., G, n, ...)  -- free reshape
    sort_dim = axis + 1                # the inserted n_per_group dimension

    # Glue: bring the group-member axis to the front, flatten the rest into a
    # dense lane axis -> (n, M) slab for the kernel.
    moved = jnp.moveaxis(grouped, sort_dim, 0)     # (n, ...)
    slab = moved.reshape(n_per_group, -1)          # (n, M)
    sorted_slab = _sort_slab(slab, n_per_group)    # Pallas hot path
    sorted_moved = sorted_slab.reshape(moved.shape)
    sorted_grouped = jnp.moveaxis(sorted_moved, 0, sort_dim)
    return sorted_grouped.reshape(x.shape)


class GroupSort:
    """Parameter-free module: sorts within groups of n_per_group along `axis`."""

    def __init__(self, n_per_group: int, axis: int = -1):
        self.n_per_group = n_per_group
        self.axis = axis

    def __call__(self, x: jax.Array) -> jax.Array:
        return group_sort(x, self.n_per_group, self.axis)


if __name__ == "__main__":
    key = jax.random.PRNGKey(0)
    k1, k2, k3, k4 = jax.random.split(key, 4)

    # Case 1: default axis=-1 (batch=2, seq=8, hidden=32, groups of 4).
    x1 = jax.random.normal(k1, (2, 8, 32), dtype=jnp.float32)
    out1 = jax.block_until_ready(GroupSort(4, axis=-1)(x1))
    ref1 = jnp.sort(x1.reshape(2, 8, 8, 4), axis=-1).reshape(x1.shape)
    assert out1.shape == x1.shape and out1.dtype == x1.dtype
    assert jnp.array_equal(out1, ref1), "axis=-1 mismatch"

    # Case 2: negative non-last axis (previously mishandled): channels on axis=-2.
    x2 = jax.random.normal(k2, (2, 16, 24), dtype=jnp.float32)
    out2 = jax.block_until_ready(GroupSort(4, axis=-2)(x2))
    ref2 = jnp.sort(x2.reshape(2, 4, 4, 24), axis=2).reshape(x2.shape)
    assert jnp.array_equal(out2, ref2), "axis=-2 mismatch"

    # Case 3: bf16, power-of-two group size 8 (Batcher network, original dtype kept).
    x3 = jax.random.normal(k3, (4, 8, 64), dtype=jnp.bfloat16)
    out3 = jax.block_until_ready(GroupSort(8, axis=-1)(x3))
    ref3 = jnp.sort(x3.reshape(4, 8, 8, 8), axis=-1).reshape(x3.shape)
    assert out3.dtype == jnp.bfloat16
    assert jnp.array_equal(out3, ref3), "bf16 group-of-8 mismatch"

    # Case 4: larger input exercising the wide-block / chunked fori_loop path
    # (grid length >= 2 so both v7x TensorCores get work).
    x4 = jax.random.normal(k4, (4, 512, 256), dtype=jnp.float32)
    out4 = jax.block_until_ready(GroupSort(4, axis=-1)(x4))
    ref4 = jnp.sort(x4.reshape(4, 512, 64, 4), axis=-1).reshape(x4.shape)
    assert jnp.array_equal(out4, ref4), "wide-block path mismatch"

    print("KERNEL_OK")
</pallas_src>

<mosaic_0001>
module attributes {stable_mosaic.version = 11 : i64} {
  func.func @kernel(%arg0: i32, %arg1: memref<4x1x128xf32, #tpu.memory_space<vmem>>, %arg2: memref<4x1x128xf32, #tpu.memory_space<vmem>>) attributes {dimension_semantics = [#tpu.dimension_semantics<parallel>], iteration_bounds = array<i64: 1>, scalar_prefetch = 0 : i64, scratch_operands = 0 : i64, tpu.core_type = #tpu.core_type<tc>, window_params = [{transform_indices = @transform_0, window_bounds = array<i64: 4, 1, 128>}, {transform_indices = @transform_1, window_bounds = array<i64: 4, 1, 128>}]} {
    %c0 = arith.constant 0 : index
    %c0_0 = arith.constant 0 : index
    %c0_1 = arith.constant 0 : index
    %0 = vector.load %arg1[%c0, %c0_0, %c0_1] : memref<4x1x128xf32, #tpu.memory_space<vmem>>, vector<1x1x128xf32>
    %1 = vector.shape_cast %0 : vector<1x1x128xf32> to vector<1x128xf32>
    %c1 = arith.constant 1 : index
    %c0_2 = arith.constant 0 : index
    %c0_3 = arith.constant 0 : index
    %2 = vector.load %arg1[%c1, %c0_2, %c0_3] : memref<4x1x128xf32, #tpu.memory_space<vmem>>, vector<1x1x128xf32>
    %3 = vector.shape_cast %2 : vector<1x1x128xf32> to vector<1x128xf32>
    %c2 = arith.constant 2 : index
    %c0_4 = arith.constant 0 : index
    %c0_5 = arith.constant 0 : index
    %4 = vector.load %arg1[%c2, %c0_4, %c0_5] : memref<4x1x128xf32, #tpu.memory_space<vmem>>, vector<1x1x128xf32>
    %5 = vector.shape_cast %4 : vector<1x1x128xf32> to vector<1x128xf32>
    %c3 = arith.constant 3 : index
    %c0_6 = arith.constant 0 : index
    %c0_7 = arith.constant 0 : index
    %6 = vector.load %arg1[%c3, %c0_6, %c0_7] : memref<4x1x128xf32, #tpu.memory_space<vmem>>, vector<1x1x128xf32>
    %7 = vector.shape_cast %6 : vector<1x1x128xf32> to vector<1x128xf32>
    %8 = arith.minimumf %1, %3 : vector<1x128xf32>
    %9 = arith.maximumf %1, %3 : vector<1x128xf32>
    %10 = arith.minimumf %5, %7 : vector<1x128xf32>
    %11 = arith.maximumf %5, %7 : vector<1x128xf32>
    %12 = arith.minimumf %8, %10 : vector<1x128xf32>
    %13 = arith.maximumf %8, %10 : vector<1x128xf32>
    %14 = arith.minimumf %9, %11 : vector<1x128xf32>
    %15 = arith.maximumf %9, %11 : vector<1x128xf32>
    %16 = arith.minimumf %14, %13 : vector<1x128xf32>
    %17 = arith.maximumf %14, %13 : vector<1x128xf32>
    %c0_8 = arith.constant 0 : index
    %c0_9 = arith.constant 0 : index
    %c0_10 = arith.constant 0 : index
    %18 = vector.load %arg2[%c0_8, %c0_9, %c0_10] : memref<4x1x128xf32, #tpu.memory_space<vmem>>, vector<1x1x128xf32>
    %19 = vector.shape_cast %18 : vector<1x1x128xf32> to vector<1x128xf32>
    %20 = vector.shape_cast %12 : vector<1x128xf32> to vector<1x1x128xf32>
    tpu.vector_store %arg2[%c0_8, %c0_9, %c0_10], %20 {strides = array<i32>} : memref<4x1x128xf32, #tpu.memory_space<vmem>>, vector<1x1x128xf32>,
    %c1_11 = arith.constant 1 : index
    %c0_12 = arith.constant 0 : index
    %c0_13 = arith.constant 0 : index
    %21 = vector.load %arg2[%c1_11, %c0_12, %c0_13] : memref<4x1x128xf32, #tpu.memory_space<vmem>>, vector<1x1x128xf32>
    %22 = vector.shape_cast %21 : vector<1x1x128xf32> to vector<1x128xf32>
    %23 = vector.shape_cast %16 : vector<1x128xf32> to vector<1x1x128xf32>
    tpu.vector_store %arg2[%c1_11, %c0_12, %c0_13], %23 {strides = array<i32>} : memref<4x1x128xf32, #tpu.memory_space<vmem>>, vector<1x1x128xf32>,
    %c2_14 = arith.constant 2 : index
    %c0_15 = arith.constant 0 : index
    %c0_16 = arith.constant 0 : index
    %24 = vector.load %arg2[%c2_14, %c0_15, %c0_16] : memref<4x1x128xf32, #tpu.memory_space<vmem>>, vector<1x1x128xf32>
    %25 = vector.shape_cast %24 : vector<1x1x128xf32> to vector<1x128xf32>
    %26 = vector.shape_cast %17 : vector<1x128xf32> to vector<1x1x128xf32>
    tpu.vector_store %arg2[%c2_14, %c0_15, %c0_16], %26 {strides = array<i32>} : memref<4x1x128xf32, #tpu.memory_space<vmem>>, vector<1x1x128xf32>,
    %c3_17 = arith.constant 3 : index
    %c0_18 = arith.constant 0 : index
    %c0_19 = arith.constant 0 : index
    %27 = vector.load %arg2[%c3_17, %c0_18, %c0_19] : memref<4x1x128xf32, #tpu.memory_space<vmem>>, vector<1x1x128xf32>
    %28 = vector.shape_cast %27 : vector<1x1x128xf32> to vector<1x128xf32>
    %29 = vector.shape_cast %15 : vector<1x128xf32> to vector<1x1x128xf32>
    tpu.vector_store %arg2[%c3_17, %c0_18, %c0_19], %29 {strides = array<i32>} : memref<4x1x128xf32, #tpu.memory_space<vmem>>, vector<1x1x128xf32>,
    return
  }
  func.func @transform_0(%arg0: i32) -> (i32, i32, i32) {
    %c0_i32 = arith.constant 0 : i32
    %c0_i32_0 = arith.constant 0 : i32
    %c0_i32_1 = arith.constant 0 : i32
    return %c0_i32, %arg0, %c0_i32_0 : i32, i32, i32
  }
  func.func @transform_1(%arg0: i32) -> (i32, i32, i32) {
    %c0_i32 = arith.constant 0 : i32
    %c0_i32_0 = arith.constant 0 : i32
    %c0_i32_1 = arith.constant 0 : i32
    return %c0_i32, %arg0, %c0_i32_0 : i32, i32, i32
  }
}

</mosaic_0001>

<bundles_post_ra>
// kernel: tpu_custom_call.1
= control target key start
LH: loop header
LB: loop body
LE: loop exit
PB: predicated region body
PF: predicated region fallthrough
CT: control target
= control target key end

     0   :  { %6 = vsyncpa [#allocation3], 0  ;;  %s150_s0 = inlined_call_operand.hbm [shape: f32[4,1,128], index: 0, kind: input, shape index: {}]   ;;  %s151_s1 = inlined_call_operand.hbm [shape: f32[4,1,128], index: 1, kind: output, shape index: {}]  }
   0x1   :  { %7 = vsyncpa [#allocation4], 0  ;;  %s12_s8 = sshll.u32 %s150_s0, 4  ;;  %s124_s9 = smov [#allocation2]   ;;  %s13_s8 = int_to_ptr.hbm [resolvable:$true] %s12_s8 }
   0x2   :  { %s14_s10 = sshll.u32 %s124_s9, 4  ;;  %s125_s11 = smov 16   ;;  %s15_s10 = int_to_ptr.vmem [resolvable:$true] %s14_s10 }
   0x3   :  { %s126_s12 = smov 1  }
   0x4   :  { %20 = dma.hbm_to_vmem [thread:$0]  %s13_s8, 64, %s15_s10, [#allocation3], %s125_s11, %s125_s11, %s126_s12  }
   0x5   :  { %120 = dma.done.wait [#allocation3], 64  }
   0x6   :  { %121 = vsyncadd [#allocation3], 4294967232  ;;  %v25_v0 = vld [vmem:[#allocation2] sm:$0x1]  ;;  %v27_v1 = vld [vmem:[#allocation2 + $0x1] sm:$0x1] }
   0x7   :  { %v29_v2 = vld [vmem:[#allocation2 + $0x2] sm:$0x1]  ;;  %v31_v3 = vld [vmem:[#allocation2 + $0x3] sm:$0x1]  ;;  %v32_v4 = vmin.f32 %v25_v0, %v27_v1  ;;  %v33_v5 = vmax.f32 %v25_v0, %v27_v1  ;;  %s127_s0 = smov [#allocation5]   ;;  %s55_s16 = sshll.u32 %s151_s1, 4  ;;  %s56_s16 = int_to_ptr.hbm [resolvable:$true] %s55_s16 }
   0x8   :  { %v34_v6 = vmin.f32 %v29_v2, %v31_v3  ;;  %v35_v7 = vmax.f32 %v29_v2, %v31_v3  ;;  %s53_s13 = sshll.u32 %s127_s0, 4  ;;  %s54_s13 = int_to_ptr.vmem [resolvable:$true] %s53_s13 }
   0xa   :  { %v36_v8 = vmin.f32 %v32_v4, %v34_v6  ;;  %v37_v9 = vmax.f32 %v32_v4, %v34_v6  ;;  %v38_v10 = vmin.f32 %v33_v5, %v35_v7  ;;  %v39_v11 = vmax.f32 %v33_v5, %v35_v7 }
   0xc   :  { %42 = vst [vmem:[#allocation5] sm:$0x1] %v36_v8  ;;  %v40_v12 = vmin.f32 %v38_v10, %v37_v9  ;;  %v41_v13 = vmax.f32 %v38_v10, %v37_v9 }
   0xd   :  { %48 = vst [vmem:[#allocation5 + $0x3] sm:$0x1] %v39_v11 }
   0xe   :  { %44 = vst [vmem:[#allocation5 + $0x1] sm:$0x1] %v40_v12 }
   0xf   :  { %46 = vst [vmem:[#allocation5 + $0x2] sm:$0x1] %v41_v13 }
  0x10   :  { %61 = dma.vmem_to_hbm [thread:$0]  %s54_s13, 64, %s56_s16, [#allocation4], %s125_s11, %s125_s11, %s126_s12  }
  0x11   :  { %122 = dma.done.wait [#allocation4], 64  }
  0x12   :  { %123 = vsyncadd [#allocation4], 4294967232 }
  0x13   :  { %66 = vsyncpa [#allocation3], 1 }
  0x14   :  { %67 = vsyncpa [#allocation4], 1 }

</bundles_post_ra>
